<compile_context>
chip_gen: v7x
topology: tpu7x:2x2x1
jax: 0.10.0
libtpu: 0.0.40
codegen_flags: <defaults>
</compile_context>

<pallas_src>
import functools

import jax
import jax.numpy as jnp
from jax.experimental import pallas as pl
from jax.experimental.pallas import tpu as pltpu

IN_FEATURES = 9
IN_PAD = 16        # fc1 contraction dim padded 9 -> 16 (host-side, one time)
OUT_FEATURES = 2
OUT_PAD = 128      # lane-dense output block; real logits live in [:, :2]
HIDDEN = (120, 84, 32, 10)
LAYER_SIZES = [(IN_FEATURES, 120), (120, 84), (84, 32), (32, 10), (10, OUT_FEATURES)]


def _round_up(n, m):
    return -(-n // m) * m


def _sigmoid(z):
    # exp and the approximate reciprocal both go to the EUP slot,
    # keeping the VALU slot free.
    return pl.reciprocal(1.0 + jnp.exp(-z), approx=True)


def mlp_kernel(x_ref,
               w1_ref, b1_ref,
               w2_ref, b2_ref,
               w3_ref, b3_ref,
               w4_ref, b4_ref,
               w5_ref, b5_ref,
               o_ref):
    def dense(h, w_ref, b_ref):
        # matmul operands in the weight dtype (f32 or bf16), accumulate in f32,
        # bias-add in f32.
        y = jnp.dot(h.astype(w_ref.dtype), w_ref[...],
                    preferred_element_type=jnp.float32)
        return y + b_ref[...]

    h = x_ref[...]                                   # (TB, 16)
    h = _sigmoid(dense(h, w1_ref, b1_ref))           # (TB, 120)
    h = _sigmoid(dense(h, w2_ref, b2_ref))           # (TB, 84)
    h = _sigmoid(dense(h, w3_ref, b3_ref))           # (TB, 32)
    h = _sigmoid(dense(h, w4_ref, b4_ref))           # (TB, 10)
    o_ref[...] = dense(h, w5_ref, b5_ref).astype(o_ref.dtype)   # (TB, 128)


def prepare_params(params, use_bf16=False):
    """Host-side, one-time padding/casting of the PyTorch-equivalent params.

    params: list of (W, b), W in (in, out) layout, b in (1, out).
    Pads fc1's in-dim 9 -> IN_PAD and fc5's out-dim 2 -> OUT_PAD with zeros,
    optionally casts weights to bf16 (biases stay f32).
    """
    w_dtype = jnp.bfloat16 if use_bf16 else jnp.float32
    prepared = []
    n = len(params)
    for i, (w, b) in enumerate(params):
        w = jnp.asarray(w, jnp.float32)
        b = jnp.asarray(b, jnp.float32).reshape(1, -1)
        if i == 0:
            w = jnp.pad(w, ((0, IN_PAD - w.shape[0]), (0, 0)))
        if i == n - 1:
            w = jnp.pad(w, ((0, 0), (0, OUT_PAD - w.shape[1])))
            b = jnp.pad(b, ((0, 0), (0, OUT_PAD - b.shape[1])))
        prepared.append((w.astype(w_dtype), b))
    return prepared


@functools.partial(jax.jit, static_argnames=("block_b",))
def neural_network_forward(x, prepared_params, *, block_b=512):
    """x: (B, 9). prepared_params: output of prepare_params. Returns (B, 2) f32."""
    B, F = x.shape
    w_dtype = prepared_params[0][0].dtype

    # Batch tile: large (multiple of 256 via default 512) for real batches,
    # clamped to a multiple of 8 for tiny demo batches.
    TB = min(block_b, _round_up(B, 8))
    B_pad = _round_up(B, TB)
    grid = (B_pad // TB,)

    # One pad op handles both batch padding and fc1-contraction padding.
    x_pad = jnp.pad(x.astype(w_dtype), ((0, B_pad - B), (0, IN_PAD - F)))

    flat = [x_pad]
    in_specs = [pl.BlockSpec((TB, IN_PAD), lambda i: (i, 0))]
    for w, b in prepared_params:
        flat += [w, b]
        # Constant index_map -> weights/biases stay VMEM-resident across steps.
        in_specs += [pl.BlockSpec(w.shape, lambda i: (0, 0)),
                     pl.BlockSpec(b.shape, lambda i: (0, 0))]

    flops = 2 * B_pad * sum(fi * fo for fi, fo in
                            [(IN_PAD, 120), (120, 84), (84, 32), (32, 10), (10, OUT_PAD)])
    transcendentals = B_pad * sum(HIDDEN)
    bytes_accessed = (x_pad.size * x_pad.dtype.itemsize
                      + B_pad * OUT_PAD * 4
                      + sum(a.size * a.dtype.itemsize
                            for w, b in prepared_params for a in (w, b)))

    out = pl.pallas_call(
        mlp_kernel,
        out_shape=jax.ShapeDtypeStruct((B_pad, OUT_PAD), jnp.float32),
        grid=grid,
        in_specs=in_specs,
        out_specs=pl.BlockSpec((TB, OUT_PAD), lambda i: (i, 0)),
        compiler_params=pltpu.CompilerParams(
            dimension_semantics=("parallel",)),
        cost_estimate=pl.CostEstimate(flops=flops,
                                      transcendentals=transcendentals,
                                      bytes_accessed=bytes_accessed),
    )(*flat)

    return out[:B, :OUT_FEATURES]


def init_params(key):
    """Deterministic init matching nn.Linear default: U(-1/sqrt(fan_in), +)."""
    params = []
    for (fan_in, fan_out) in LAYER_SIZES:
        key, kw, kb = jax.random.split(key, 3)
        bound = 1.0 / jnp.sqrt(jnp.float32(fan_in))
        w = jax.random.uniform(kw, (fan_in, fan_out), jnp.float32, -bound, bound)
        b = jax.random.uniform(kb, (1, fan_out), jnp.float32, -bound, bound)
        params.append((w, b))
    return params


def reference_forward(x, params):
    """Pure-JAX reference for correctness check (unpadded f32 params)."""
    h = x
    for i, (w, b) in enumerate(params):
        h = h @ w + b
        if i < len(params) - 1:
            h = jax.nn.sigmoid(h)
    return h


if __name__ == "__main__":
    key = jax.random.PRNGKey(0)
    params = init_params(key)

    # ---- small batch, single grid step, f32 operands ----
    x8 = jax.random.normal(jax.random.fold_in(key, 1), (8, IN_FEATURES), jnp.float32)
    p_f32 = prepare_params(params, use_bf16=False)
    out8 = jax.block_until_ready(neural_network_forward(x8, p_f32))
    ref8 = reference_forward(x8, params)
    assert out8.shape == (8, OUT_FEATURES)
    assert jnp.allclose(out8, ref8, atol=1e-2, rtol=1e-2), "f32 small-batch mismatch"

    # ---- batch not divisible by the tile: multi-step grid + batch padding ----
    x50 = jax.random.normal(jax.random.fold_in(key, 2), (50, IN_FEATURES), jnp.float32)
    out50 = jax.block_until_ready(neural_network_forward(x50, p_f32, block_b=16))
    ref50 = reference_forward(x50, params)
    assert out50.shape == (50, OUT_FEATURES)
    assert jnp.allclose(out50, ref50, atol=1e-2, rtol=1e-2), "f32 gridded mismatch"

    # ---- bf16 matmul operands (v6e/v7x friendly), f32 accumulation ----
    p_bf16 = prepare_params(params, use_bf16=True)
    out_bf = jax.block_until_ready(neural_network_forward(x50, p_bf16, block_b=16))
    assert jnp.allclose(out_bf, ref50, atol=5e-2, rtol=5e-2), "bf16 path mismatch"

    print("KERNEL_OK")
</pallas_src>

<mosaic_0001>
module attributes {stable_mosaic.version = 11 : i64} {
  func.func @mlp_kernel(%arg0: i32, %arg1: memref<8x16xf32, #tpu.memory_space<vmem>>, %arg2: memref<16x120xf32, #tpu.memory_space<vmem>>, %arg3: memref<1x120xf32, #tpu.memory_space<vmem>>, %arg4: memref<120x84xf32, #tpu.memory_space<vmem>>, %arg5: memref<1x84xf32, #tpu.memory_space<vmem>>, %arg6: memref<84x32xf32, #tpu.memory_space<vmem>>, %arg7: memref<1x32xf32, #tpu.memory_space<vmem>>, %arg8: memref<32x10xf32, #tpu.memory_space<vmem>>, %arg9: memref<1x10xf32, #tpu.memory_space<vmem>>, %arg10: memref<10x128xf32, #tpu.memory_space<vmem>>, %arg11: memref<1x128xf32, #tpu.memory_space<vmem>>, %arg12: memref<8x128xf32, #tpu.memory_space<vmem>>) attributes {dimension_semantics = [#tpu.dimension_semantics<parallel>], iteration_bounds = array<i64: 1>, scalar_prefetch = 0 : i64, scratch_operands = 0 : i64, tpu.core_type = #tpu.core_type<tc>, window_params = [{transform_indices = @transform_0, window_bounds = array<i64: 8, 16>}, {pipeline_mode = #tpu.pipeline_mode<synchronous>, transform_indices = @transform_1, window_bounds = array<i64: 16, 120>}, {pipeline_mode = #tpu.pipeline_mode<synchronous>, transform_indices = @transform_2, window_bounds = array<i64: 1, 120>}, {pipeline_mode = #tpu.pipeline_mode<synchronous>, transform_indices = @transform_3, window_bounds = array<i64: 120, 84>}, {pipeline_mode = #tpu.pipeline_mode<synchronous>, transform_indices = @transform_4, window_bounds = array<i64: 1, 84>}, {pipeline_mode = #tpu.pipeline_mode<synchronous>, transform_indices = @transform_5, window_bounds = array<i64: 84, 32>}, {pipeline_mode = #tpu.pipeline_mode<synchronous>, transform_indices = @transform_6, window_bounds = array<i64: 1, 32>}, {pipeline_mode = #tpu.pipeline_mode<synchronous>, transform_indices = @transform_7, window_bounds = array<i64: 32, 10>}, {pipeline_mode = #tpu.pipeline_mode<synchronous>, transform_indices = @transform_8, window_bounds = array<i64: 1, 10>}, {pipeline_mode = #tpu.pipeline_mode<synchronous>, transform_indices = @transform_9, window_bounds = array<i64: 10, 128>}, {pipeline_mode = #tpu.pipeline_mode<synchronous>, transform_indices = @transform_10, window_bounds = array<i64: 1, 128>}, {transform_indices = @transform_11, window_bounds = array<i64: 8, 128>}]} {
    %c0 = arith.constant 0 : index
    %c0_0 = arith.constant 0 : index
    %0 = vector.load %arg1[%c0, %c0_0] : memref<8x16xf32, #tpu.memory_space<vmem>>, vector<8x16xf32>
    %c0_1 = arith.constant 0 : index
    %c0_2 = arith.constant 0 : index
    %1 = vector.load %arg2[%c0_1, %c0_2] : memref<16x120xf32, #tpu.memory_space<vmem>>, vector<16x120xf32>
    %cst = arith.constant dense<0.000000e+00> : vector<8x120xf32>
    %2 = tpu.matmul %0, %1, %cst {dimension_numbers = #tpu.dot_dimension_numbers<[1], [0], [0], [1], [0, 0, 1, 1], [], []>} : vector<8x16xf32>, vector<16x120xf32>, vector<8x120xf32> -> vector<8x120xf32>
    %c0_3 = arith.constant 0 : index
    %c0_4 = arith.constant 0 : index
    %3 = vector.load %arg3[%c0_3, %c0_4] : memref<1x120xf32, #tpu.memory_space<vmem>>, vector<1x120xf32>
    %4 = vector.broadcast %3 : vector<1x120xf32> to vector<8x120xf32>
    %5 = arith.addf %2, %4 : vector<8x120xf32>
    %cst_5 = arith.constant 0.000000e+00 : f32
    %6 = vector.broadcast %cst_5 : f32 to vector<8x120xf32>
    %7 = arith.subf %6, %5 : vector<8x120xf32>
    %8 = math.exp %7 : vector<8x120xf32>
    %cst_6 = arith.constant 1.000000e+00 : f32
    %9 = vector.broadcast %cst_6 : f32 to vector<8x120xf32>
    %10 = arith.addf %9, %8 : vector<8x120xf32>
    %11 = tpu.reciprocal %10 {approx = true} : vector<8x120xf32> -> vector<8x120xf32>
    %c0_7 = arith.constant 0 : index
    %c0_8 = arith.constant 0 : index
    %12 = vector.load %arg4[%c0_7, %c0_8] : memref<120x84xf32, #tpu.memory_space<vmem>>, vector<120x84xf32>
    %cst_9 = arith.constant dense<0.000000e+00> : vector<8x84xf32>
    %13 = tpu.matmul %11, %12, %cst_9 {dimension_numbers = #tpu.dot_dimension_numbers<[1], [0], [0], [1], [0, 0, 1, 1], [], []>} : vector<8x120xf32>, vector<120x84xf32>, vector<8x84xf32> -> vector<8x84xf32>
    %c0_10 = arith.constant 0 : index
    %c0_11 = arith.constant 0 : index
    %14 = vector.load %arg5[%c0_10, %c0_11] : memref<1x84xf32, #tpu.memory_space<vmem>>, vector<1x84xf32>
    %15 = vector.broadcast %14 : vector<1x84xf32> to vector<8x84xf32>
    %16 = arith.addf %13, %15 : vector<8x84xf32>
    %cst_12 = arith.constant 0.000000e+00 : f32
    %17 = vector.broadcast %cst_12 : f32 to vector<8x84xf32>
    %18 = arith.subf %17, %16 : vector<8x84xf32>
    %19 = math.exp %18 : vector<8x84xf32>
    %cst_13 = arith.constant 1.000000e+00 : f32
    %20 = vector.broadcast %cst_13 : f32 to vector<8x84xf32>
    %21 = arith.addf %20, %19 : vector<8x84xf32>
    %22 = tpu.reciprocal %21 {approx = true} : vector<8x84xf32> -> vector<8x84xf32>
    %c0_14 = arith.constant 0 : index
    %c0_15 = arith.constant 0 : index
    %23 = vector.load %arg6[%c0_14, %c0_15] : memref<84x32xf32, #tpu.memory_space<vmem>>, vector<84x32xf32>
    %cst_16 = arith.constant dense<0.000000e+00> : vector<8x32xf32>
    %24 = tpu.matmul %22, %23, %cst_16 {dimension_numbers = #tpu.dot_dimension_numbers<[1], [0], [0], [1], [0, 0, 1, 1], [], []>} : vector<8x84xf32>, vector<84x32xf32>, vector<8x32xf32> -> vector<8x32xf32>
    %c0_17 = arith.constant 0 : index
    %c0_18 = arith.constant 0 : index
    %25 = vector.load %arg7[%c0_17, %c0_18] : memref<1x32xf32, #tpu.memory_space<vmem>>, vector<1x32xf32>
    %26 = vector.broadcast %25 : vector<1x32xf32> to vector<8x32xf32>
    %27 = arith.addf %24, %26 : vector<8x32xf32>
    %cst_19 = arith.constant 0.000000e+00 : f32
    %28 = vector.broadcast %cst_19 : f32 to vector<8x32xf32>
    %29 = arith.subf %28, %27 : vector<8x32xf32>
    %30 = math.exp %29 : vector<8x32xf32>
    %cst_20 = arith.constant 1.000000e+00 : f32
    %31 = vector.broadcast %cst_20 : f32 to vector<8x32xf32>
    %32 = arith.addf %31, %30 : vector<8x32xf32>
    %33 = tpu.reciprocal %32 {approx = true} : vector<8x32xf32> -> vector<8x32xf32>
    %c0_21 = arith.constant 0 : index
    %c0_22 = arith.constant 0 : index
    %34 = vector.load %arg8[%c0_21, %c0_22] : memref<32x10xf32, #tpu.memory_space<vmem>>, vector<32x10xf32>
    %cst_23 = arith.constant dense<0.000000e+00> : vector<8x10xf32>
    %35 = tpu.matmul %33, %34, %cst_23 {dimension_numbers = #tpu.dot_dimension_numbers<[1], [0], [0], [1], [0, 0, 1, 1], [], []>} : vector<8x32xf32>, vector<32x10xf32>, vector<8x10xf32> -> vector<8x10xf32>
    %c0_24 = arith.constant 0 : index
    %c0_25 = arith.constant 0 : index
    %36 = vector.load %arg9[%c0_24, %c0_25] : memref<1x10xf32, #tpu.memory_space<vmem>>, vector<1x10xf32>
    %37 = vector.broadcast %36 : vector<1x10xf32> to vector<8x10xf32>
    %38 = arith.addf %35, %37 : vector<8x10xf32>
    %cst_26 = arith.constant 0.000000e+00 : f32
    %39 = vector.broadcast %cst_26 : f32 to vector<8x10xf32>
    %40 = arith.subf %39, %38 : vector<8x10xf32>
    %41 = math.exp %40 : vector<8x10xf32>
    %cst_27 = arith.constant 1.000000e+00 : f32
    %42 = vector.broadcast %cst_27 : f32 to vector<8x10xf32>
    %43 = arith.addf %42, %41 : vector<8x10xf32>
    %44 = tpu.reciprocal %43 {approx = true} : vector<8x10xf32> -> vector<8x10xf32>
    %c0_28 = arith.constant 0 : index
    %c0_29 = arith.constant 0 : index
    %45 = vector.load %arg10[%c0_28, %c0_29] : memref<10x128xf32, #tpu.memory_space<vmem>>, vector<10x128xf32>
    %cst_30 = arith.constant dense<0.000000e+00> : vector<8x128xf32>
    %46 = tpu.matmul %44, %45, %cst_30 {dimension_numbers = #tpu.dot_dimension_numbers<[1], [0], [0], [1], [0, 0, 1, 1], [], []>} : vector<8x10xf32>, vector<10x128xf32>, vector<8x128xf32> -> vector<8x128xf32>
    %c0_31 = arith.constant 0 : index
    %c0_32 = arith.constant 0 : index
    %47 = vector.load %arg11[%c0_31, %c0_32] : memref<1x128xf32, #tpu.memory_space<vmem>>, vector<1x128xf32>
    %48 = vector.broadcast %47 : vector<1x128xf32> to vector<8x128xf32>
    %49 = arith.addf %46, %48 : vector<8x128xf32>
    %c0_33 = arith.constant 0 : index
    %c0_34 = arith.constant 0 : index
    %50 = vector.load %arg12[%c0_33, %c0_34] : memref<8x128xf32, #tpu.memory_space<vmem>>, vector<8x128xf32>
    tpu.vector_store %arg12[%c0_33, %c0_34], %49 {strides = array<i32>} : memref<8x128xf32, #tpu.memory_space<vmem>>, vector<8x128xf32>,
    return
  }
  func.func @transform_0(%arg0: i32) -> (i32, i32) {
    %c0_i32 = arith.constant 0 : i32
    %c0_i32_0 = arith.constant 0 : i32
    return %arg0, %c0_i32 : i32, i32
  }
  func.func @transform_1(%arg0: i32) -> (i32, i32) {
    %c0_i32 = arith.constant 0 : i32
    %c0_i32_0 = arith.constant 0 : i32
    %c0_i32_1 = arith.constant 0 : i32
    return %c0_i32, %c0_i32_0 : i32, i32
  }
  func.func @transform_2(%arg0: i32) -> (i32, i32) {
    %c0_i32 = arith.constant 0 : i32
    %c0_i32_0 = arith.constant 0 : i32
    %c0_i32_1 = arith.constant 0 : i32
    return %c0_i32, %c0_i32_0 : i32, i32
  }
  func.func @transform_3(%arg0: i32) -> (i32, i32) {
    %c0_i32 = arith.constant 0 : i32
    %c0_i32_0 = arith.constant 0 : i32
    %c0_i32_1 = arith.constant 0 : i32
    return %c0_i32, %c0_i32_0 : i32, i32
  }
  func.func @transform_4(%arg0: i32) -> (i32, i32) {
    %c0_i32 = arith.constant 0 : i32
    %c0_i32_0 = arith.constant 0 : i32
    %c0_i32_1 = arith.constant 0 : i32
    return %c0_i32, %c0_i32_0 : i32, i32
  }
  func.func @transform_5(%arg0: i32) -> (i32, i32) {
    %c0_i32 = arith.constant 0 : i32
    %c0_i32_0 = arith.constant 0 : i32
    %c0_i32_1 = arith.constant 0 : i32
    return %c0_i32, %c0_i32_0 : i32, i32
  }
  func.func @transform_6(%arg0: i32) -> (i32, i32) {
    %c0_i32 = arith.constant 0 : i32
    %c0_i32_0 = arith.constant 0 : i32
    %c0_i32_1 = arith.constant 0 : i32
    return %c0_i32, %c0_i32_0 : i32, i32
  }
  func.func @transform_7(%arg0: i32) -> (i32, i32) {
    %c0_i32 = arith.constant 0 : i32
    %c0_i32_0 = arith.constant 0 : i32
    %c0_i32_1 = arith.constant 0 : i32
    return %c0_i32, %c0_i32_0 : i32, i32
  }
  func.func @transform_8(%arg0: i32) -> (i32, i32) {
    %c0_i32 = arith.constant 0 : i32
    %c0_i32_0 = arith.constant 0 : i32
    %c0_i32_1 = arith.constant 0 : i32
    return %c0_i32, %c0_i32_0 : i32, i32
  }
  func.func @transform_9(%arg0: i32) -> (i32, i32) {
    %c0_i32 = arith.constant 0 : i32
    %c0_i32_0 = arith.constant 0 : i32
    %c0_i32_1 = arith.constant 0 : i32
    return %c0_i32, %c0_i32_0 : i32, i32
  }
  func.func @transform_10(%arg0: i32) -> (i32, i32) {
    %c0_i32 = arith.constant 0 : i32
    %c0_i32_0 = arith.constant 0 : i32
    %c0_i32_1 = arith.constant 0 : i32
    return %c0_i32, %c0_i32_0 : i32, i32
  }
  func.func @transform_11(%arg0: i32) -> (i32, i32) {
    %c0_i32 = arith.constant 0 : i32
    %c0_i32_0 = arith.constant 0 : i32
    return %arg0, %c0_i32 : i32, i32
  }
}

</mosaic_0001>

<bundles_post_ra>
// kernel: neural_network_forward.1
= control target key start
LH: loop header
LB: loop body
LE: loop exit
PB: predicated region body
PF: predicated region fallthrough
CT: control target
= control target key end

     0   :  { %v714_v0 = vmov 0.0|0.0   ;;  %vm715_vm0 = vmmov 0   ;;  %v716_v3 = vmov 0.0   ;;  %vm48_vm1 = vcmask 130048   ;;  %s929_s1 = inlined_call_operand.vmem [shape: f32[16,120], index: 1, kind: input, shape index: {}]   ;;  %s930_s0 = inlined_call_operand.vmem [shape: f32[8,16], index: 0, kind: input, shape index: {}]   ;;  %s931_s3 = inlined_call_operand.vmem [shape: f32[120,84], index: 3, kind: input, shape index: {}]   ;;  %s932_s2 = inlined_call_operand.vmem [shape: f32[1,120], index: 2, kind: input, shape index: {}]   ;;  %s933_s5 = inlined_call_operand.vmem [shape: f32[84,32], index: 5, kind: input, shape index: {}]   ;;  %s934_s4 = inlined_call_operand.vmem [shape: f32[1,84], index: 4, kind: input, shape index: {}]   ;;  %s935_s7 = inlined_call_operand.vmem [shape: f32[32,10], index: 7, kind: input, shape index: {}]   ;;  %s936_s6 = inlined_call_operand.vmem [shape: f32[1,32], index: 6, kind: input, shape index: {}]   ;;  %s937_s9 = inlined_call_operand.vmem [shape: f32[10,128], index: 9, kind: input, shape index: {}]   ;;  %s938_s8 = inlined_call_operand.vmem [shape: f32[1,10], index: 8, kind: input, shape index: {}]   ;;  %s939_s10 = inlined_call_operand.vmem [shape: f32[1,128], index: 10, kind: input, shape index: {}]   ;;  %s940_s11 = inlined_call_operand.vmem [shape: f32[8,128], index: 11, kind: output, shape index: {}]  }
   0x1   :  { %645 = vmatprep.subr.bf16.mxu0 %v714_v0  ;;  %v39_v1 = vld [vmem:[%s929_s1] sm:$0xff]  ;;  %v40_v2 = vld [vmem:[%s929_s1 + $0x8] sm:$0xff]  ;;  %566 = vmatprep.mubr.msk.f32.mxu0 %vm715_vm0, %v716_v3  ;;  %v129_v9 = vld [vmem:[%s931_s3 + $0x10] sm:$0xff]  ;;  %vm149_vm2 = vcmask 982016   ;;  %vm250_vm3 = vcmask 1043456   ;;  %vm246_vm4 = vcmask 687104  }
   0x2   :  { %v646_v4 = vpack.c.bf16 %v40_v2, %v39_v1  ;;  %648 = vmatprep.subr.bf16.mxu1 %v714_v0  ;;  %599 = vmatprep.mubr.msk.f32.mxu1 %vm715_vm0, %v716_v3  ;;  %v38_v5 = vld [vmem:[%s930_s0] sm:$0xff]  ;;  %v128_v7 = vld [vmem:[%s931_s3 + $0x8] sm:$0xff]  ;;  %v130_v10 = vld [vmem:[%s931_s3 + $0x18] sm:$0xff]  ;;  %vm340_vm5 = vcmask 261120   ;;  %vm432_vm6 = vcmask 1041408   ;;  %vm717_vm7 = vmmov 1  }
   0x3   :  { %v127_v6 = vld [vmem:[%s931_s3] sm:$0xff]  ;;  %v652_v11 = vpack.c.bf16 %v130_v10, %v129_v9  ;;  %v132_v13 = vld [vmem:[%s931_s3 + $0x28] sm:$0xff]  ;;  %v133_v15 = vld [vmem:[%s931_s3 + $0x30] sm:$0xff]  ;;  %vm428_vm9 = vcmask 80896  }
   0x4   :  { %647 = vmatpush3.bf16.msra.mxu0 %v646_v4  ;;  %v649_v8 = vpack.c.bf16 %v128_v7, %v127_v6  ;;  %v131_v12 = vld [vmem:[%s931_s3 + $0x20] sm:$0xff]  ;;  %v134_v16 = vld [vmem:[%s931_s3 + $0x38] sm:$0xff]  ;;  %v136_v19 = vld [vmem:[%s931_s3 + $0x48] sm:$0xff] }
   0x5   :  { %669 = vmatprep.subr.bf16.mxu0 %v714_v0  ;;  %v655_v14 = vpack.c.bf16 %v132_v13, %v131_v12  ;;  %v658_v17 = vpack.c.bf16 %v134_v16, %v133_v15  ;;  %v135_v18 = vld [vmem:[%s931_s3 + $0x40] sm:$0xff]  ;;  %v137_v21 = vld [vmem:[%s931_s3 + $0x50] sm:$0xff]  ;;  %v138_v22 = vld [vmem:[%s931_s3 + $0x58] sm:$0xff] }
   0x6   :  { %650 = vmatpush3.bf16.msra.mxu1 %v649_v8  ;;  %v661_v20 = vpack.c.bf16 %v136_v19, %v135_v18  ;;  %v664_v23 = vpack.c.bf16 %v138_v22, %v137_v21  ;;  %v139_v24 = vld [vmem:[%s931_s3 + $0x60] sm:$0xff]  ;;  %v140_v25 = vld [vmem:[%s931_s3 + $0x68] sm:$0xff]  ;;  %v141_v27 = vld [vmem:[%s931_s3 + $0x70] sm:$0xff] }
   0x7   :  { %567 = vmatmul.mubr.msk.f32.vlgmr.msra.gmra.mrb[0].mxu0 %vm48_vm1, %v38_v5  ;;  %651 = vmatprep.subr.bf16.mxu1 %v714_v0  ;;  %v667_v26 = vpack.c.bf16 %v140_v25, %v139_v24  ;;  %v511_v28 = vld [vmem:[%s932_s2] ss:$0 sm:$0xff]  ;;  %v229_v38 = vld [vmem:[%s933_s5 + $0x8] sm:$0xff]  ;;  %v230_v40 = vld [vmem:[%s933_s5 + $0x10] sm:$0xff] }
   0x8   :  { %624 = vmatprep.mubr.msk.f32.mxu0 %vm715_vm0, %v716_v3  ;;  %v228_v37 = vld [vmem:[%s933_s5] sm:$0xff]  ;;  %v231_v41 = vld [vmem:[%s933_s5 + $0x18] sm:$0xff]  ;;  %v233_v44 = vld [vmem:[%s933_s5 + $0x28] sm:$0xff] }
   0x9   :  { %v670_v39 = vpack.c.bf16 %v229_v38, %v228_v37  ;;  %v673_v42 = vpack.c.bf16 %v231_v41, %v230_v40  ;;  %v232_v43 = vld [vmem:[%s933_s5 + $0x20] sm:$0xff]  ;;  %v234_v46 = vld [vmem:[%s933_s5 + $0x30] sm:$0xff]  ;;  %v235_v47 = vld [vmem:[%s933_s5 + $0x38] sm:$0xff] }
   0xa   :  { %653 = vmatpush3.bf16.msra.mxu1 %v652_v11  ;;  %v676_v45 = vpack.c.bf16 %v233_v44, %v232_v43  ;;  %v679_v48 = vpack.c.bf16 %v235_v47, %v234_v46  ;;  %v236_v49 = vld [vmem:[%s933_s5 + $0x40] sm:$0xff]  ;;  %v237_v50 = vld [vmem:[%s933_s5 + $0x48] sm:$0xff]  ;;  %v238_v52 = vld [vmem:[%s933_s5 + $0x50] sm:$0xf] }
   0xb   :  { %654 = vmatprep.subr.bf16.mxu1 %v714_v0  ;;  %671 = vmatpush3.bf16.msra.mxu0 %v670_v39  ;;  %v682_v51 = vpack.c.bf16 %v237_v50, %v236_v49  ;;  %v513_v53 = vld [vmem:[%s934_s4] ss:$0 sm:$0xff]  ;;  %v330_v63 = vld [vmem:[%s935_s7 + $0x8] sm:$0xff]  ;;  %v331_v1 = vld [vmem:[%s935_s7 + $0x10] sm:$0xff] }
   0xc   :  { %672 = vmatprep.subr.bf16.mxu0 %v714_v0  ;;  %v329_v62 = vld [vmem:[%s935_s7] sm:$0xff]  ;;  %v332_v4 = vld [vmem:[%s935_s7 + $0x18] sm:$0xff]  ;;  %vm692_vm8 = vmpackc.low %vm432_vm6, %vm717_vm7 }
   0xd   :  { %v685_v2 = vpack.c.bf16 %v330_v63, %v329_v62  ;;  %v688_v5 = vpack.c.bf16 %v332_v4, %v331_v1  ;;  %v518_v16 = vld [vmem:[%s938_s8] ss:$0 sm:$0xff] }
   0xe   :  { %656 = vmatpush3.bf16.msra.mxu1 %v655_v14  ;;  %v420_v14 = vld [vmem:[%s937_s9 + $0x8] sm:$0x3]  ;;  %v520_v25 = vld [vmem:[%s939_s10] ss:$0 sm:$0xff] }
   0xf   :  { %657 = vmatprep.subr.bf16.mxu1 %v714_v0  ;;  %674 = vmatpush3.bf16.msra.mxu0 %v673_v42 }
  0x10   :  { %675 = vmatprep.subr.bf16.mxu0 %v714_v0 }
  0x12   :  { %659 = vmatpush3.bf16.msra.mxu1 %v658_v17 }
  0x13   :  { %660 = vmatprep.subr.bf16.mxu1 %v714_v0  ;;  %677 = vmatpush3.bf16.msra.mxu0 %v676_v45 }
  0x14   :  { %678 = vmatprep.subr.bf16.mxu0 %v714_v0 }
  0x16   :  { %662 = vmatpush3.bf16.msra.mxu1 %v661_v20 }
  0x17   :  { %663 = vmatprep.subr.bf16.mxu1 %v714_v0  ;;  %680 = vmatpush3.bf16.msra.mxu0 %v679_v48 }
  0x18   :  { %681 = vmatprep.subr.bf16.mxu0 %v714_v0 }
  0x1a   :  { %665 = vmatpush3.bf16.msra.mxu1 %v664_v23 }
  0x1b   :  { %666 = vmatprep.subr.bf16.mxu1 %v714_v0  ;;  %683 = vmatpush3.bf16.msra.mxu0 %v682_v51 }
  0x1c   :  { %622 = vmatprep.subr.mxu0 %v716_v3 }
  0x1e   :  { %668 = vmatpush3.bf16.msra.mxu1 %v667_v26 }
  0x1f   :  { %597 = vmatprep.subr.mxu1 %v716_v3  ;;  %623 = vmatpush3.msk.msra.mxu0 %vm250_vm3, %v238_v52 }
  0x20   :  { %684 = vmatprep.subr.bf16.mxu0 %v714_v0 }
  0x22   :  { %598 = vmatpush3.msra.mxu1 %v141_v27 }
  0x23   :  { %690 = vmatprep.subr.bf16.mxu1 %v714_v0 }
  0xda   :  { %v118_v29 = vpop.f32.mrb[0].mxu0 }
  0xdb   :  { %v119_v30 = vadd.f32 %v511_v28, %v118_v29  ;;  %v568_v31 = vpop.f32.mrb[1].mxu0 }
  0xdd   :  { %v122_v32 = vsub.f32 0.0, %v119_v30 }
  0xdf   :  { %v123_v33 = vmul.f32 1.442695, %v122_v32 }
  0xe1   :  { %698 = vpow2.f32 %v123_v33 }
  0xeb   :  { %v699_v34 = vpop.eup %698 }
  0xec   :  { %v125_v35 = vadd.f32 1.0, %v699_v34 }
  0xee   :  { %700 = vrcp.f32 %v125_v35 }
  0xf8   :  { %v701_v36 = vpop.eup %700 }
  0xf9   :  { %600 = vmatmul.mubr.msk.f32.vlgmr.msra.gmra.mrb[0].mxu1 %vm149_vm2, %v701_v36 }
  0xfa   :  { %642 = vmatprep.mubr.msk.f32.mxu1 %vm715_vm0, %v716_v3 }
 0x1cc   :  { %v219_v54 = vpop.f32.mrb[0].mxu1 }
 0x1cd   :  { %v220_v55 = vadd.f32 %v513_v53, %v219_v54  ;;  %v601_v56 = vpop.f32.mrb[1].mxu1 }
 0x1cf   :  { %v223_v57 = vsub.f32 0.0, %v220_v55 }
 0x1d1   :  { %v224_v58 = vmul.f32 1.442695, %v223_v57 }
 0x1d3   :  { %702 = vpow2.f32 %v224_v58 }
 0x1dd   :  { %v703_v59 = vpop.eup %702 }
 0x1de   :  { %v226_v60 = vadd.f32 1.0, %v703_v59 }
 0x1e0   :  { %704 = vrcp.f32 %v226_v60 }
 0x1ea   :  { %v705_v61 = vpop.eup %704 }
 0x1eb   :  { %625 = vmatmul.mubr.msk.f32.vlgmr.msra.gmra.mrb[2].mxu0 %vm246_vm4, %v705_v61 }
 0x1ec   :  { %635 = vmatprep.mubr.msk.f32.mxu0 %vm715_vm0, %v716_v3  ;;  %686 = vmatpush3.bf16.msra.mxu0 %v685_v2  ;;  %v515_v3 = vld [vmem:[%s936_s6] ss:$0 sm:$0xff] }
 0x1ed   :  { %687 = vmatprep.subr.bf16.mxu0 %v714_v0  ;;  %v419_v0 = vld [vmem:[%s937_s9] sm:$0xff] }
 0x1ee   :  { %v691_v15 = vpack.c.bf16 %v420_v14, %v419_v0 }
 0x1f0   :  { %689 = vmatpush3.bf16.msra.mxu0 %v688_v5  ;;  %693 = vmatpush3.bf16.msk.msra.mxu1 %vm692_vm8, %v691_v15 }
 0x2be   :  { %v320_v6 = vpop.f32.mrb[2].mxu0 }
 0x2bf   :  { %v321_v7 = vadd.f32 %v515_v3, %v320_v6  ;;  %v626_v8 = vpop.f32.mrb[3].mxu0 }
 0x2c1   :  { %v324_v9 = vsub.f32 0.0, %v321_v7 }
 0x2c3   :  { %v325_v10 = vmul.f32 1.442695, %v324_v9 }
 0x2c5   :  { %706 = vpow2.f32 %v325_v10 }
 0x2cf   :  { %v707_v11 = vpop.eup %706 }
 0x2d0   :  { %v327_v12 = vadd.f32 1.0, %v707_v11 }
 0x2d2   :  { %708 = vrcp.f32 %v327_v12 }
 0x2dc   :  { %v709_v13 = vpop.eup %708 }
 0x2dd   :  { %636 = vmatmul.mubr.msk.f32.vlgmr.msra.gmra.mrb[4].mxu0 %vm340_vm5, %v709_v13 }
 0x3b0   :  { %v410_v17 = vpop.f32.mrb[4].mxu0 }
 0x3b1   :  { %v411_v18 = vadd.f32 %v518_v16, %v410_v17  ;;  %v637_v19 = vpop.f32.mrb[5].mxu0 }
 0x3b3   :  { %v414_v20 = vsub.f32 0.0, %v411_v18 }
 0x3b5   :  { %v415_v21 = vmul.f32 1.442695, %v414_v20 }
 0x3b7   :  { %710 = vpow2.f32 %v415_v21 }
 0x3c1   :  { %v711_v22 = vpop.eup %710 }
 0x3c2   :  { %v417_v23 = vadd.f32 1.0, %v711_v22 }
 0x3c4   :  { %712 = vrcp.f32 %v417_v23 }
 0x3ce   :  { %v713_v24 = vpop.eup %712 }
 0x3cf   :  { %643 = vmatmul.mubr.msk.f32.vlgmr.msra.gmra.mrb[2].mxu1 %vm428_vm9, %v713_v24 }
 0x4a2   :  { %v502_v26 = vpop.f32.mrb[2].mxu1 }
 0x4a3   :  { %v503_v27 = vadd.f32 %v520_v25, %v502_v26  ;;  %v644_v28 = vpop.f32.mrb[3].mxu1 }
 0x4a5   :  { %506 = vst [vmem:[%s940_s11] sm:$0xff] %v503_v27 }

</bundles_post_ra>
